<compile_context>
chip_gen: v7x
topology: tpu7x:2x2x1
jax: 0.10.0
libtpu: 0.0.40
codegen_flags: <defaults>
</compile_context>

<pallas_src>
import jax
import jax.numpy as jnp
from jax.experimental import pallas as pl
from jax.experimental.pallas import tpu as pltpu


def _downsample_matmul_kernel(x_ref, w_ref, b_ref, o_ref):
    # x_ref: (M, Kp)  bf16 row patches, Kp = 256 (zero-padded contraction)
    # w_ref: (Kp, Nc) bf16 block-Toeplitz conv weights, Nc = Wo*C
    # b_ref: (1, Nc)  f32 bias tiled over Wo
    # o_ref: (M, Nc)  f32 lane-dense output slab
    acc = jnp.dot(x_ref[...], w_ref[...], preferred_element_type=jnp.float32)
    o_ref[...] = (acc + b_ref[...]).astype(o_ref.dtype)


def downsample_block(x, weight, bias):
    """x: (N, C, H, W) f32.  weight: (C, C, 3, 3) OIHW.  bias: (C,).
    Returns (N, C, Ho, Wo) == Conv2d(C,C,3,2,0)(F.pad(x,(0,1,0,1)))."""
    N, C, H, W = x.shape
    Hp, Wp = H + 1, W + 1                      # F.pad(x, (0,1,0,1))
    Ho = (Hp - 3) // 2 + 1
    Wo = (Wp - 3) // 2 + 1
    K0 = 3 * Wp * C                            # true contraction, order (kh, w, cin)
    Kp = max(256, -(-K0 // 256) * 256)         # zero-pad K to a multiple of 256
    Nc = Wo * C                                # output lanes, order (ow, cout)
    M = N * Ho                                 # output sublanes, order (n, oh)

    # ---- patches: patches[n*Ho+oh, kh*Wp*C + w*C + cin] = x_pad[n, 2*oh+kh, w, cin]
    x_nhwc = jnp.transpose(x, (0, 2, 3, 1))                          # (N,H,W,C)
    x_pad = jnp.pad(x_nhwc, ((0, 0), (0, 1), (0, 1), (0, 0)))        # (N,Hp,Wp,C)
    rows = [x_pad[:, kh:kh + 2 * Ho - 1:2] for kh in range(3)]       # 3 x (N,Ho,Wp,C)
    patches = jnp.stack(rows, axis=2).reshape(M, K0)
    patches = jnp.pad(patches, ((0, 0), (0, Kp - K0))).astype(jnp.bfloat16)

    # ---- weights: wmat[kh*Wp*C + w*C + cin, ow*C + cout] = weight[cout,cin,kh,w-2*ow]
    # (zero when w - 2*ow is outside [0,3); max selected w = 2*Wo <= Wp-1, so
    #  every pad column / pad K row is provably never selected).
    kw_i = jnp.arange(3)[:, None, None]
    w_i = jnp.arange(Wp)[None, :, None]
    ow_i = jnp.arange(Wo)[None, None, :]
    sel = (w_i == 2 * ow_i + kw_i).astype(weight.dtype)              # (3, Wp, Wo)
    wmat = jnp.einsum('oikq,qwv->kwivo', weight, sel).reshape(K0, Nc)
    wmat = jnp.pad(wmat, ((0, Kp - K0), (0, 0))).astype(jnp.bfloat16)
    brow = jnp.tile(bias, Wo).reshape(1, Nc).astype(jnp.float32)     # bias[cout] at ow*C+cout

    # ---- Pallas: single grid step, one MXU push, everything VMEM-resident (<50 KB)
    flops = 2 * M * Kp * Nc
    bytes_accessed = 2 * (patches.size + wmat.size) + 4 * (brow.size + M * Nc)
    out2d = pl.pallas_call(
        _downsample_matmul_kernel,
        out_shape=jax.ShapeDtypeStruct((M, Nc), x.dtype),
        grid_spec=pltpu.PrefetchScalarGridSpec(
            num_scalar_prefetch=0,
            grid=(1,),
            in_specs=[
                pl.BlockSpec((M, Kp), lambda i: (0, 0)),
                pl.BlockSpec((Kp, Nc), lambda i: (0, 0)),
                pl.BlockSpec((1, Nc), lambda i: (0, 0)),
            ],
            out_specs=pl.BlockSpec((M, Nc), lambda i: (0, 0)),
        ),
        cost_estimate=pl.CostEstimate(
            flops=flops, transcendentals=0, bytes_accessed=bytes_accessed),
    )(patches, wmat, brow)

    # back to NCHW (module contract; drop if downstream consumes NHWC)
    return out2d.reshape(N, Ho, Wo, C).transpose(0, 3, 1, 2)


if __name__ == "__main__":
    key = jax.random.PRNGKey(0)
    kx, kw, kb = jax.random.split(key, 3)
    N, C, H, W = 2, 4, 16, 16

    x = jax.random.normal(kx, (N, C, H, W), jnp.float32)
    # deterministic param init (PyTorch-like uniform(-1/sqrt(fan_in), +..))
    fan_in = C * 3 * 3
    bound = 1.0 / (fan_in ** 0.5)
    weight = jax.random.uniform(kw, (C, C, 3, 3), jnp.float32, -bound, bound)
    bias = jax.random.uniform(kb, (C,), jnp.float32, -bound, bound)

    out = jax.jit(downsample_block)(x, weight, bias)
    out = jax.block_until_ready(out)

    # reference 1: module semantics in f32
    x_pad = jnp.pad(x, ((0, 0), (0, 0), (0, 1), (0, 1)))
    ref_f32 = jax.lax.conv_general_dilated(
        x_pad, weight, window_strides=(2, 2), padding="VALID",
        dimension_numbers=("NCHW", "OIHW", "NCHW")) + bias[None, :, None, None]

    # reference 2: same bf16-rounded operands, f32 accumulation -> tight kernel check
    ref_bf16 = jax.lax.conv_general_dilated(
        x_pad.astype(jnp.bfloat16), weight.astype(jnp.bfloat16),
        window_strides=(2, 2), padding="VALID",
        dimension_numbers=("NCHW", "OIHW", "NCHW"),
        preferred_element_type=jnp.float32) + bias[None, :, None, None]

    assert out.shape == ref_f32.shape == (N, C, 8, 8)
    assert jnp.allclose(out, ref_bf16, atol=1e-4, rtol=1e-4)   # kernel exactness (bf16 inputs)
    assert jnp.allclose(out, ref_f32, atol=3e-2, rtol=3e-2)    # module semantics at bf16 precision
    print("KERNEL_OK")
</pallas_src>

<mosaic_0001>
module attributes {stable_mosaic.version = 11 : i64} {
  func.func @_downsample_matmul_kernel(%arg0: i32, %arg1: memref<16x256xbf16, #tpu.memory_space<vmem>>, %arg2: memref<256x32xbf16, #tpu.memory_space<vmem>>, %arg3: memref<1x32xf32, #tpu.memory_space<vmem>>, %arg4: memref<16x32xf32, #tpu.memory_space<vmem>>) attributes {dimension_semantics = [#tpu.dimension_semantics<arbitrary>], iteration_bounds = array<i64: 1>, scalar_prefetch = 0 : i64, scratch_operands = 0 : i64, tpu.core_type = #tpu.core_type<tc>, window_params = [{pipeline_mode = #tpu.pipeline_mode<synchronous>, transform_indices = @transform_0, window_bounds = array<i64: 16, 256>}, {pipeline_mode = #tpu.pipeline_mode<synchronous>, transform_indices = @transform_1, window_bounds = array<i64: 256, 32>}, {pipeline_mode = #tpu.pipeline_mode<synchronous>, transform_indices = @transform_2, window_bounds = array<i64: 1, 32>}, {pipeline_mode = #tpu.pipeline_mode<synchronous>, transform_indices = @transform_3, window_bounds = array<i64: 16, 32>}]} {
    %c0 = arith.constant 0 : index
    %c0_0 = arith.constant 0 : index
    %0 = vector.load %arg1[%c0, %c0_0] : memref<16x256xbf16, #tpu.memory_space<vmem>>, vector<16x256xbf16>
    %c0_1 = arith.constant 0 : index
    %c0_2 = arith.constant 0 : index
    %1 = vector.load %arg2[%c0_1, %c0_2] : memref<256x32xbf16, #tpu.memory_space<vmem>>, vector<256x32xbf16>
    %cst = arith.constant dense<0.000000e+00> : vector<16x32xf32>
    %2 = tpu.matmul %0, %1, %cst {dimension_numbers = #tpu.dot_dimension_numbers<[1], [0], [0], [1], [0, 0, 1, 1], [], []>} : vector<16x256xbf16>, vector<256x32xbf16>, vector<16x32xf32> -> vector<16x32xf32>
    %c0_3 = arith.constant 0 : index
    %c0_4 = arith.constant 0 : index
    %3 = vector.load %arg3[%c0_3, %c0_4] : memref<1x32xf32, #tpu.memory_space<vmem>>, vector<1x32xf32>
    %4 = vector.broadcast %3 : vector<1x32xf32> to vector<16x32xf32>
    %5 = arith.addf %2, %4 : vector<16x32xf32>
    %c0_5 = arith.constant 0 : index
    %c0_6 = arith.constant 0 : index
    %6 = vector.load %arg4[%c0_5, %c0_6] : memref<16x32xf32, #tpu.memory_space<vmem>>, vector<16x32xf32>
    tpu.vector_store %arg4[%c0_5, %c0_6], %5 {strides = array<i32>} : memref<16x32xf32, #tpu.memory_space<vmem>>, vector<16x32xf32>,
    return
  }
  func.func @transform_0(%arg0: i32) -> (i32, i32) {
    %c0_i32 = arith.constant 0 : i32
    %c0_i32_0 = arith.constant 0 : i32
    %c0_i32_1 = arith.constant 0 : i32
    return %c0_i32, %c0_i32_0 : i32, i32
  }
  func.func @transform_1(%arg0: i32) -> (i32, i32) {
    %c0_i32 = arith.constant 0 : i32
    %c0_i32_0 = arith.constant 0 : i32
    %c0_i32_1 = arith.constant 0 : i32
    return %c0_i32, %c0_i32_0 : i32, i32
  }
  func.func @transform_2(%arg0: i32) -> (i32, i32) {
    %c0_i32 = arith.constant 0 : i32
    %c0_i32_0 = arith.constant 0 : i32
    %c0_i32_1 = arith.constant 0 : i32
    return %c0_i32, %c0_i32_0 : i32, i32
  }
  func.func @transform_3(%arg0: i32) -> (i32, i32) {
    %c0_i32 = arith.constant 0 : i32
    %c0_i32_0 = arith.constant 0 : i32
    %c0_i32_1 = arith.constant 0 : i32
    return %c0_i32, %c0_i32_0 : i32, i32
  }
}

</mosaic_0001>

<bundles_post_ra>
// kernel: tile.8
= control target key start
LH: loop header
LB: loop body
LE: loop exit
PB: predicated region body
PF: predicated region fallthrough
CT: control target
= control target key end

     0   :  { %s22_s0 = inlined_call_operand.vmem [shape: f32[4], index: 0, kind: input, shape index: {}]   ;;  %s23_s1 = inlined_call_operand.vmem [shape: f32[8,4], index: 1, kind: output, shape index: {}]  }
   0x1   :  { %v4_v0 = vld [vmem:[%s22_s0] ss:$0 sm:$0xff] }
   0x2   :  { %5 = vst [vmem:[%s23_s1] sm:$0xff] %v4_v0 }

// kernel: tile.9
= control target key start
LH: loop header
LB: loop body
LE: loop exit
PB: predicated region body
PF: predicated region fallthrough
CT: control target
= control target key end

     0   :  { %s67_s10 = smov 28   ;;  %s68_s11 = smov 20   ;;  %vm3_vm0 = vcmask 31744   ;;  %vm9_vm1 = vcmask 261344   ;;  %vm15_vm2 = vcmask 228544   ;;  %vm21_vm3 = vcmask 195744   ;;  %s111_s0 = inlined_call_operand.vmem [shape: f32[8,4], index: 0, kind: input, shape index: {}]   ;;  %s112_s1 = inlined_call_operand.vmem [shape: f32[1,32], index: 1, kind: output, shape index: {}]  }
   0x1   :  { %v53_v0 = vld [vmem:[%s111_s0 + $0x7] sm:$0x1]   ;;  %v55_v1 = vld [vmem:[%s111_s0 + $0x5] sm:$0x1]   ;;  %v54_v2 = vld [vmem:[%s111_s0 + $0x6] sm:$0x1]  }
   0x2   :  { %7 = vrot.lane.b32.xlu0 %v53_v0, %s67_s10  ;;  %19 = vrot.lane.b32.xlu1 %v55_v1, %s68_s11  ;;  %v56_v3 = vld [vmem:[%s111_s0 + $0x4] sm:$0x1]   ;;  %v2_v4 = vld [vmem:[%s111_s0] sm:$0x1]   ;;  %s69_s18 = smov 24   ;;  %s70_s19 = smov 16  }
   0x3   :  { %4 = vst.msk [vmem:[#allocation0] sm:$0x1] %vm3_vm0, %v2_v4   ;;  %v57_v5 = vld [vmem:[%s111_s0 + $0x3] sm:$0x1]   ;;  %v58_v6 = vld [vmem:[%s111_s0 + $0x2] sm:$0x1]  }
   0x4   :  { %s71_s24 = smov 12   ;;  %s72_s25 = smov 8   ;;  %v59_v7 = vld [vmem:[%s111_s0 + $0x1] sm:$0x1]   ;;  %vm27_vm4 = vcmask 162944   ;;  %vm33_vm5 = vcmask 130144  }
   0x5   :  { %s73_s0 = smov 4   ;;  %vm39_vm6 = vcmask 97344   ;;  %vm45_vm7 = vcmask 64544  }
   0x6   :  { %13 = vrot.lane.b32.xlu0 %v54_v2, %s69_s18  ;;  %25 = vrot.lane.b32.xlu1 %v56_v3, %s70_s19 }
   0xa   :  { %31 = vrot.lane.b32.xlu0 %v57_v5, %s71_s24  ;;  %37 = vrot.lane.b32.xlu1 %v58_v6, %s72_s25 }
   0xe   :  { %43 = vrot.lane.b32.xlu0 %v59_v7, %s73_s0 }
  0x74   :  { %v8_v8 = vpop.permute.xlu0 %7   ;;  %v20_v9 = vpop.permute.xlu1 %19  }
  0x75   :  { %10 = vst.msk [vmem:[#allocation0] sm:$0x1] %vm9_vm1, %v8_v8  }
  0x78   :  { %v14_v10 = vpop.permute.xlu0 %13   ;;  %v26_v11 = vpop.permute.xlu1 %25  }
  0x79   :  { %16 = vst.msk [vmem:[#allocation0] sm:$0x1] %vm15_vm2, %v14_v10  }
  0x7a   :  { %22 = vst.msk [vmem:[#allocation0] sm:$0x1] %vm21_vm3, %v20_v9  }
  0x7b   :  { %28 = vst.msk [vmem:[#allocation0] sm:$0x1] %vm27_vm4, %v26_v11  }
  0x7c   :  { %v32_v12 = vpop.permute.xlu0 %31   ;;  %v38_v13 = vpop.permute.xlu1 %37  }
  0x7d   :  { %34 = vst.msk [vmem:[#allocation0] sm:$0x1] %vm33_vm5, %v32_v12  }
  0x7e   :  { %40 = vst.msk [vmem:[#allocation0] sm:$0x1] %vm39_vm6, %v38_v13  }
  0x80   :  { %v44_v14 = vpop.permute.xlu0 %43  }
  0x81   :  { %46 = vst.msk [vmem:[#allocation0] sm:$0x1] %vm45_vm7, %v44_v14  }
  0x88   :  { %v50_v15 = vld [vmem:[#allocation0] sm:$0x1] }
  0x89   :  { %52 = vst [vmem:[%s112_s1] sm:$0x1] %v50_v15 }

// kernel: downsample_block.1
= control target key start
LH: loop header
LB: loop body
LE: loop exit
PB: predicated region body
PF: predicated region fallthrough
CT: control target
= control target key end

     0   :  { %vm203_vm0 = vcmask 261120   ;;  %s353_s1 = inlined_call_operand.vmem [shape: bf16[256,32], index: 1, kind: input, shape index: {}]   ;;  %s354_s0 = inlined_call_operand.vmem [shape: bf16[16,256], index: 0, kind: input, shape index: {}]   ;;  %s355_s2 = inlined_call_operand.vmem [shape: f32[1,32], index: 2, kind: input, shape index: {}]   ;;  %s356_s3 = inlined_call_operand.vmem [shape: f32[16,32], index: 3, kind: output, shape index: {}]  }
   0x1   :  { %v251_v0 = vld [vmem:[%s353_s1 + $0x40] sm:$0xff]   ;;  %v253_v2 = vld [vmem:[%s353_s1 + $0x48] sm:$0xff]   ;;  %v255_v4 = vld [vmem:[%s353_s1 + $0x50] sm:$0xff]  }
   0x2   :  { %v252_v1 = vld [vmem:[%s353_s1] sm:$0xff]   ;;  %229 = vmatprep.subr.bf16.mxu0 %v251_v0  ;;  %v254_v3 = vld [vmem:[%s353_s1 + $0x8] sm:$0xff]   ;;  %v256_v5 = vld [vmem:[%s353_s1 + $0x10] sm:$0xff]  }
   0x3   :  { %230 = vmatpush3.bf16.msra.mxu0 %v252_v1  ;;  %v257_v6 = vld [vmem:[%s353_s1 + $0x58] sm:$0xff]   ;;  %v259_v8 = vld [vmem:[%s353_s1 + $0x60] sm:$0xff]   ;;  %v261_v10 = vld [vmem:[%s353_s1 + $0x68] sm:$0xff]  }
   0x4   :  { %231 = vmatprep.subr.bf16.mxu0 %v253_v2  ;;  %v258_v7 = vld [vmem:[%s353_s1 + $0x18] sm:$0xff]   ;;  %v260_v9 = vld [vmem:[%s353_s1 + $0x20] sm:$0xff]   ;;  %v262_v12 = vld [vmem:[%s353_s1 + $0x28] sm:$0xff]  }
   0x5   :  { %v269_v11 = vld [vmem:[%s354_s0 + $0x4] ss:$8 sps:$4 sm:$0xff]   ;;  %v263_v13 = vld [vmem:[%s353_s1 + $0x70] sm:$0xff]   ;;  %v265_v15 = vld [vmem:[%s353_s1 + $0x78] sm:$0xff]  }
   0x6   :  { %194 = vmatprep.mubr.bf16.mxu0 %v269_v11  ;;  %v264_v14 = vld [vmem:[%s353_s1 + $0x30] sm:$0xff]   ;;  %v266_v16 = vld [vmem:[%s353_s1 + $0x38] sm:$0xff]   ;;  %v267_v17 = vld [vmem:[%s354_s0] ss:$8 sps:$4 sm:$0xff]  }
   0x7   :  { %232 = vmatpush3.bf16.msra.mxu0 %v254_v3  ;;  %v210_v19 = vld [vmem:[%s355_s2] ss:$0 sm:$0xff] }
   0x8   :  { %233 = vmatprep.subr.bf16.mxu0 %v255_v4 }
   0xb   :  { %234 = vmatpush3.bf16.msra.mxu0 %v256_v5 }
   0xc   :  { %235 = vmatprep.subr.bf16.mxu0 %v257_v6 }
   0xf   :  { %236 = vmatpush3.bf16.msra.mxu0 %v258_v7 }
  0x10   :  { %237 = vmatprep.subr.bf16.mxu0 %v259_v8 }
  0x13   :  { %238 = vmatpush3.bf16.msra.mxu0 %v260_v9 }
  0x14   :  { %239 = vmatprep.subr.bf16.mxu0 %v261_v10 }
  0x17   :  { %240 = vmatpush3.bf16.msra.mxu0 %v262_v12 }
  0x18   :  { %241 = vmatprep.subr.bf16.mxu0 %v263_v13 }
  0x1b   :  { %242 = vmatpush3.bf16.msra.mxu0 %v264_v14 }
  0x1c   :  { %243 = vmatprep.subr.bf16.mxu0 %v265_v15 }
  0x1f   :  { %244 = vmatpush3.bf16.msra.mxu0 %v266_v16 }
  0x22   :  { %195 = vmatmul.mubr.bf16.vlgmr.msra.gmra.mrb[0].mxu0 %v267_v17 }
  0xf5   :  { %v245_v18 = vpop.f32.mrb[0].mxu0 }
  0xf6   :  { %v246_v20 = vpop.f32.mrb[1].mxu0 }
  0xf7   :  { %v247_v21 = vadd.f32 %v246_v20, %v245_v18  ;;  %v248_v22 = vpop.f32.mrb[2].mxu0 }
  0xf8   :  { %v249_v23 = vpop.f32.mrb[3].mxu0 }
  0xf9   :  { %v197_v24 = vadd.f32 %v247_v21, %v210_v19  ;;  %v250_v25 = vadd.f32 %v249_v23, %v248_v22 }
  0xfb   :  { %204 = vst.msk [vmem:[%s356_s3] sm:$0xff] %vm203_vm0, %v197_v24  ;;  %v200_v26 = vadd.f32 %v250_v25, %v210_v19 }
  0xfd   :  { %205 = vst.msk [vmem:[%s356_s3 + $0x8] sm:$0xff] %vm203_vm0, %v200_v26 }

</bundles_post_ra>
